<compile_context>
chip_gen: v7x
topology: tpu7x:2x2x1
jax: 0.10.0
libtpu: 0.0.40
codegen_flags: <defaults>
</compile_context>

<pallas_src>
import jax
import jax.numpy as jnp
from jax.experimental import pallas as pl
from jax.experimental.pallas import tpu as pltpu


def _decoder_kernel(z_ref, w1_ref, b1_ref, w2_ref, b2_ref, out_ref):
    # z_ref : [TE, 2C] bf16   w1_ref: [2C, C] bf16   b1_ref: [1, C] f32
    # w2_ref: [C, L]  f32     b2_ref: [1, L]  f32    out_ref: [TE, L] f32
    h = jnp.dot(z_ref[...], w1_ref[...], preferred_element_type=jnp.float32)
    h = jnp.maximum(h + b1_ref[...], 0.0)              # bias + ReLU in f32
    o = jnp.dot(h, w2_ref[...], preferred_element_type=jnp.float32)
    out_ref[...] = (o + b2_ref[...]).astype(out_ref.dtype)


def _round_up(x, m):
    return ((x + m - 1) // m) * m


def decoder_forward(z_comp, z_rec, edge_label_index, w1, b1, w2, b2, *,
                    tile_e=16384, use_bf16=True):
    """Pallas implementation of Decoder.forward.

    z_comp: [N_comp, C]  z_rec: [N_rec, C]  edge_label_index: [2, E] int
    w1: [2*C, C]  b1: [C]  w2: [C, L]  b2: [L]
    returns: [E, L] float32
    """
    C = z_comp.shape[1]
    L = w2.shape[1]
    E = edge_label_index.shape[1]
    LANE = 128

    # --- edge-tile sizing -------------------------------------------------
    # bf16 native tile is (16, 128): round tile and padding to 16 rows.
    tile_e = max(16, min(_round_up(int(tile_e), 16), _round_up(E, 16)))
    # Double-buffered block bytes per edge-row (lane-padded to 128):
    #   z slab (bf16, 2 bufs) + out (f32, 2 bufs).
    per_row_bytes = (2 * _round_up(2 * C, LANE) * 2
                     + 2 * _round_up(L, LANE) * 4)
    # Keep blocks under ~40 MiB so we stay inside v7x's 64 MiB physical VMEM
    # (v5e/v6e have 128 MiB, so this cap is conservative there).
    tile_cap = max(16, (40 * 1024 * 1024 // per_row_bytes) // 16 * 16)
    tile_e = min(tile_e, tile_cap)

    e_pad = _round_up(E, tile_e)
    grid = (pl.cdiv(e_pad, tile_e),)

    src = edge_label_index[0].astype(jnp.int32)
    dst = edge_label_index[1].astype(jnp.int32)
    if e_pad != E:
        pad = e_pad - E
        # padded edges reuse index 0 (assumes non-empty node tables); the
        # garbage rows are sliced off below.
        src = jnp.pad(src, (0, pad))
        dst = jnp.pad(dst, (0, pad))

    cdt = jnp.bfloat16 if use_bf16 else jnp.float32

    # --- XLA-side glue: cast the node tables once (small, read-once), row
    # gather, and build ONE [E, 2C] slab.  Gather + concat + cast + pad fuse
    # in XLA, so there is no extra HBM round trip vs. two separate slabs, and
    # the kernel gets a single K=2C matmul.
    z_slab = jnp.concatenate(
        [z_comp.astype(cdt)[src], z_rec.astype(cdt)[dst]], axis=-1)  # [e_pad, 2C]

    w1c = w1.astype(cdt)                          # [2C, C]  bf16
    w2c = w2.astype(jnp.float32)                  # [C, L]   keep 2nd matmul f32
    b1_2d = b1.reshape(1, C).astype(jnp.float32)
    b2_2d = b2.reshape(1, L).astype(jnp.float32)

    # Advisory cost estimate so XLA overlaps the surrounding gather/cast ops.
    flops = 2 * e_pad * (2 * C * C + C * L)
    bytes_accessed = (e_pad * 2 * C * z_slab.dtype.itemsize
                      + e_pad * L * 4
                      + 2 * C * C * w1c.dtype.itemsize
                      + C * 4 + C * L * 4 + L * 4)
    cost = pl.CostEstimate(flops=int(flops), transcendentals=0,
                           bytes_accessed=int(bytes_accessed))

    vmem_limit = int(min(max(per_row_bytes * tile_e + 4 * 1024 * 1024,
                             16 * 1024 * 1024),
                         48 * 1024 * 1024))

    out = pl.pallas_call(
        _decoder_kernel,
        out_shape=jax.ShapeDtypeStruct((e_pad, L), jnp.float32),
        grid_spec=pltpu.PrefetchScalarGridSpec(
            num_scalar_prefetch=0,
            grid=grid,
            in_specs=[
                pl.BlockSpec((tile_e, 2 * C), lambda i: (i, 0)),   # z slab tile
                pl.BlockSpec((2 * C, C), lambda i: (0, 0)),        # W1 (whole)
                pl.BlockSpec((1, C), lambda i: (0, 0)),            # b1
                pl.BlockSpec((C, L), lambda i: (0, 0)),            # W2
                pl.BlockSpec((1, L), lambda i: (0, 0)),            # b2
            ],
            out_specs=pl.BlockSpec((tile_e, L), lambda i: (i, 0)),
        ),
        compiler_params=pltpu.CompilerParams(
            dimension_semantics=("parallel",),
            vmem_limit_bytes=vmem_limit,
        ),
        cost_estimate=cost,
    )(z_slab, w1c, b1_2d, w2c, b2_2d)

    return out[:E]


def reference_forward(z_comp, z_rec, edge_label_index, w1, b1, w2, b2,
                      input_dtype=jnp.float32):
    """Pure-JAX reference.  input_dtype=bfloat16 mimics the kernel's operand
    casts (embeddings + W1 rounded to bf16; all accumulation / bias / second
    matmul in f32)."""
    f32 = jnp.float32
    zc = z_comp.astype(input_dtype)[edge_label_index[0]].astype(f32)
    zr = z_rec.astype(input_dtype)[edge_label_index[1]].astype(f32)
    z = jnp.concatenate([zc, zr], axis=-1)
    w1c = w1.astype(input_dtype).astype(f32)
    h = jnp.maximum(z @ w1c + b1.astype(f32), 0.0)
    return h @ w2.astype(f32) + b2.astype(f32)


if __name__ == "__main__":
    key = jax.random.PRNGKey(0)

    # config: out_channels = 32, num_labels = 8
    C = 32          # config.out_channels
    L = 8           # config.num_labels
    N_COMP = 24     # number of 'composition' nodes
    N_REC = 20      # number of 'recording' nodes
    E = 16          # number of edges to decode

    k1, k2, k3, k4, k5, k6, k7, k8 = jax.random.split(key, 8)

    # node embeddings (the z_dict)
    z_comp = jax.random.normal(k1, (N_COMP, C), dtype=jnp.float32)
    z_rec = jax.random.normal(k2, (N_REC, C), dtype=jnp.float32)

    # edge_label_index: [2, E]
    src = jax.random.randint(k3, (E,), 0, N_COMP, dtype=jnp.int32)
    dst = jax.random.randint(k4, (E,), 0, N_REC, dtype=jnp.int32)
    edge_label_index = jnp.stack([src, dst], axis=0)

    # deterministic parameter init (torch Linear: W [out,in]; stored W.T [in,out])
    w1 = jax.random.normal(k5, (2 * C, C), dtype=jnp.float32) * (1.0 / jnp.sqrt(2.0 * C))
    b1 = jax.random.normal(k6, (C,), dtype=jnp.float32) * 0.01
    w2 = jax.random.normal(k7, (C, L), dtype=jnp.float32) * (1.0 / jnp.sqrt(1.0 * C))
    b2 = jax.random.normal(k8, (L,), dtype=jnp.float32) * 0.01

    # --- run 1: default tiling (clamped down to 16 rows for tiny E) --------
    out = decoder_forward(z_comp, z_rec, edge_label_index, w1, b1, w2, b2)
    out = jax.block_until_ready(out)
    assert out.shape == (E, L)

    ref_matched = reference_forward(z_comp, z_rec, edge_label_index,
                                    w1, b1, w2, b2, input_dtype=jnp.bfloat16)
    assert jnp.allclose(out, ref_matched, atol=2e-3, rtol=2e-3), \
        "mismatch vs bf16-matched reference"

    ref_f32 = reference_forward(z_comp, z_rec, edge_label_index,
                                w1, b1, w2, b2, input_dtype=jnp.float32)
    assert jnp.allclose(out, ref_f32, atol=5e-2, rtol=5e-2), \
        "mismatch vs f32 reference"

    # --- run 2: exercise padding + a multi-step grid (E=37, tile_e=16) -----
    E2 = 37
    k9, k10 = jax.random.split(k8, 2)
    src2 = jax.random.randint(k9, (E2,), 0, N_COMP, dtype=jnp.int32)
    dst2 = jax.random.randint(k10, (E2,), 0, N_REC, dtype=jnp.int32)
    eli2 = jnp.stack([src2, dst2], axis=0)

    out2 = decoder_forward(z_comp, z_rec, eli2, w1, b1, w2, b2, tile_e=16)
    out2 = jax.block_until_ready(out2)
    assert out2.shape == (E2, L)
    ref2 = reference_forward(z_comp, z_rec, eli2, w1, b1, w2, b2,
                             input_dtype=jnp.bfloat16)
    assert jnp.allclose(out2, ref2, atol=2e-3, rtol=2e-3), \
        "mismatch vs bf16-matched reference (padded/multi-tile run)"

    print("KERNEL_OK")
</pallas_src>

<mosaic_0001>
module attributes {stable_mosaic.version = 11 : i64} {
  func.func @_decoder_kernel(%arg0: i32, %arg1: memref<16x64xbf16, #tpu.memory_space<vmem>>, %arg2: memref<64x32xbf16, #tpu.memory_space<vmem>>, %arg3: memref<1x32xf32, #tpu.memory_space<vmem>>, %arg4: memref<32x8xf32, #tpu.memory_space<vmem>>, %arg5: memref<1x8xf32, #tpu.memory_space<vmem>>, %arg6: memref<16x8xf32, #tpu.memory_space<vmem>>) attributes {dimension_semantics = [#tpu.dimension_semantics<parallel>], iteration_bounds = array<i64: 1>, scalar_prefetch = 0 : i64, scratch_operands = 0 : i64, tpu.core_type = #tpu.core_type<tc>, window_params = [{transform_indices = @transform_0, window_bounds = array<i64: 16, 64>}, {pipeline_mode = #tpu.pipeline_mode<synchronous>, transform_indices = @transform_1, window_bounds = array<i64: 64, 32>}, {pipeline_mode = #tpu.pipeline_mode<synchronous>, transform_indices = @transform_2, window_bounds = array<i64: 1, 32>}, {pipeline_mode = #tpu.pipeline_mode<synchronous>, transform_indices = @transform_3, window_bounds = array<i64: 32, 8>}, {pipeline_mode = #tpu.pipeline_mode<synchronous>, transform_indices = @transform_4, window_bounds = array<i64: 1, 8>}, {transform_indices = @transform_5, window_bounds = array<i64: 16, 8>}]} {
    %c0 = arith.constant 0 : index
    %c0_0 = arith.constant 0 : index
    %0 = vector.load %arg1[%c0, %c0_0] : memref<16x64xbf16, #tpu.memory_space<vmem>>, vector<16x64xbf16>
    %c0_1 = arith.constant 0 : index
    %c0_2 = arith.constant 0 : index
    %1 = vector.load %arg2[%c0_1, %c0_2] : memref<64x32xbf16, #tpu.memory_space<vmem>>, vector<64x32xbf16>
    %cst = arith.constant dense<0.000000e+00> : vector<16x32xf32>
    %2 = tpu.matmul %0, %1, %cst {dimension_numbers = #tpu.dot_dimension_numbers<[1], [0], [0], [1], [0, 0, 1, 1], [], []>} : vector<16x64xbf16>, vector<64x32xbf16>, vector<16x32xf32> -> vector<16x32xf32>
    %c0_3 = arith.constant 0 : index
    %c0_4 = arith.constant 0 : index
    %3 = vector.load %arg3[%c0_3, %c0_4] : memref<1x32xf32, #tpu.memory_space<vmem>>, vector<1x32xf32>
    %4 = vector.broadcast %3 : vector<1x32xf32> to vector<16x32xf32>
    %5 = arith.addf %2, %4 : vector<16x32xf32>
    %cst_5 = arith.constant 0.000000e+00 : f32
    %6 = vector.broadcast %cst_5 : f32 to vector<16x32xf32>
    %7 = arith.maximumf %5, %6 : vector<16x32xf32>
    %c0_6 = arith.constant 0 : index
    %c0_7 = arith.constant 0 : index
    %8 = vector.load %arg4[%c0_6, %c0_7] : memref<32x8xf32, #tpu.memory_space<vmem>>, vector<32x8xf32>
    %cst_8 = arith.constant dense<0.000000e+00> : vector<16x8xf32>
    %9 = tpu.matmul %7, %8, %cst_8 {dimension_numbers = #tpu.dot_dimension_numbers<[1], [0], [0], [1], [0, 0, 1, 1], [], []>} : vector<16x32xf32>, vector<32x8xf32>, vector<16x8xf32> -> vector<16x8xf32>
    %c0_9 = arith.constant 0 : index
    %c0_10 = arith.constant 0 : index
    %10 = vector.load %arg5[%c0_9, %c0_10] : memref<1x8xf32, #tpu.memory_space<vmem>>, vector<1x8xf32>
    %11 = vector.broadcast %10 : vector<1x8xf32> to vector<16x8xf32>
    %12 = arith.addf %9, %11 : vector<16x8xf32>
    %c0_11 = arith.constant 0 : index
    %c0_12 = arith.constant 0 : index
    %13 = vector.load %arg6[%c0_11, %c0_12] : memref<16x8xf32, #tpu.memory_space<vmem>>, vector<16x8xf32>
    tpu.vector_store %arg6[%c0_11, %c0_12], %12 {strides = array<i32>} : memref<16x8xf32, #tpu.memory_space<vmem>>, vector<16x8xf32>,
    return
  }
  func.func @transform_0(%arg0: i32) -> (i32, i32) {
    %c0_i32 = arith.constant 0 : i32
    %c0_i32_0 = arith.constant 0 : i32
    return %arg0, %c0_i32 : i32, i32
  }
  func.func @transform_1(%arg0: i32) -> (i32, i32) {
    %c0_i32 = arith.constant 0 : i32
    %c0_i32_0 = arith.constant 0 : i32
    %c0_i32_1 = arith.constant 0 : i32
    return %c0_i32, %c0_i32_0 : i32, i32
  }
  func.func @transform_2(%arg0: i32) -> (i32, i32) {
    %c0_i32 = arith.constant 0 : i32
    %c0_i32_0 = arith.constant 0 : i32
    %c0_i32_1 = arith.constant 0 : i32
    return %c0_i32, %c0_i32_0 : i32, i32
  }
  func.func @transform_3(%arg0: i32) -> (i32, i32) {
    %c0_i32 = arith.constant 0 : i32
    %c0_i32_0 = arith.constant 0 : i32
    %c0_i32_1 = arith.constant 0 : i32
    return %c0_i32, %c0_i32_0 : i32, i32
  }
  func.func @transform_4(%arg0: i32) -> (i32, i32) {
    %c0_i32 = arith.constant 0 : i32
    %c0_i32_0 = arith.constant 0 : i32
    %c0_i32_1 = arith.constant 0 : i32
    return %c0_i32, %c0_i32_0 : i32, i32
  }
  func.func @transform_5(%arg0: i32) -> (i32, i32) {
    %c0_i32 = arith.constant 0 : i32
    %c0_i32_0 = arith.constant 0 : i32
    return %arg0, %c0_i32 : i32, i32
  }
}

</mosaic_0001>

<bundles_post_ra>
// kernel: tpu_custom_call.1
= control target key start
LH: loop header
LB: loop body
LE: loop exit
PB: predicated region body
PF: predicated region fallthrough
CT: control target
= control target key end

     0   :  { %v273_v0 = vmov 0.0   ;;  %vm274_vm0 = vmmov 0   ;;  %vm67_vm1 = vcmask 523264   ;;  %vm125_vm2 = vcmask 261120   ;;  %s344_s1 = inlined_call_operand.vmem [shape: bf16[64,32], index: 1, kind: input, shape index: {}]   ;;  %s345_s3 = inlined_call_operand.vmem [shape: f32[32,8], index: 3, kind: input, shape index: {}]   ;;  %s346_s0 = inlined_call_operand.vmem [shape: bf16[16,64], index: 0, kind: input, shape index: {}]   ;;  %s347_s2 = inlined_call_operand.vmem [shape: f32[1,32], index: 2, kind: input, shape index: {}]   ;;  %s348_s4 = inlined_call_operand.vmem [shape: f32[1,8], index: 4, kind: input, shape index: {}]   ;;  %s349_s5 = inlined_call_operand.vmem [shape: f32[16,8], index: 5, kind: output, shape index: {}]  }
   0x1   :  { %235 = vmatprep.subr.bf16.mxu0 %v273_v0  ;;  %v268_v1 = vld [vmem:[%s344_s1] sm:$0xff]   ;;  %243 = vmatprep.mubr.msk.bf16.mxu0 %vm274_vm0, %v273_v0  ;;  %v269_v2 = vld [vmem:[%s344_s1 + $0x8] sm:$0xff]   ;;  %v270_v5 = vld [vmem:[%s344_s1 + $0x10] sm:$0xff]   ;;  %vm207_vm3 = vcmask 64512  }
   0x2   :  { %236 = vmatpush3.bf16.msra.mxu0 %v268_v1  ;;  %v114_v3 = vld [vmem:[%s345_s3] sm:$0xff]  ;;  %v115_v4 = vld [vmem:[%s345_s3 + $0x8] sm:$0xff]  ;;  %v271_v7 = vld [vmem:[%s344_s1 + $0x18] sm:$0xff]  }
   0x3   :  { %237 = vmatprep.subr.bf16.mxu0 %v273_v0  ;;  %v258_v6 = vpack.c.bf16 %v115_v4, %v114_v3  ;;  %v272_v8 = vld [vmem:[%s346_s0] sm:$0xff]   ;;  %v116_v9 = vld [vmem:[%s345_s3 + $0x10] sm:$0xff]  ;;  %v117_v10 = vld [vmem:[%s345_s3 + $0x18] sm:$0xff] }
   0x4   :  { %v262_v11 = vpack.c.bf16 %v117_v10, %v116_v9  ;;  %v214_v12 = vld [vmem:[%s347_s2] ss:$0 sm:$0xff] }
   0x5   :  { %259 = vmatprep.subr.bf16.mxu1 %v258_v6  ;;  %v221_v21 = vld [vmem:[%s348_s4] ss:$0 sm:$0xff] }
   0x6   :  { %238 = vmatpush3.bf16.msra.mxu0 %v269_v2  ;;  %261 = vmatpush3.bf16.msra.mxu1 %v258_v6 }
   0x7   :  { %239 = vmatprep.subr.bf16.mxu0 %v273_v0  ;;  %263 = vmatprep.subr.bf16.mxu1 %v262_v11 }
   0xa   :  { %240 = vmatpush3.bf16.msra.mxu0 %v270_v5  ;;  %265 = vmatpush3.bf16.msra.mxu1 %v262_v11 }
   0xb   :  { %241 = vmatprep.subr.bf16.mxu0 %v273_v0 }
   0xe   :  { %242 = vmatpush3.bf16.msra.mxu0 %v271_v7 }
  0x11   :  { %244 = vmatmul.mubr.msk.bf16.vlgmr.msra.gmra.mrb[0].mxu0 %vm67_vm1, %v272_v8 }
  0xe4   :  { %v105_v13 = vpop.f32.mrb[0].mxu0 }
  0xe5   :  { %v106_v14 = vadd.f32 %v214_v12, %v105_v13  ;;  %v245_v15 = vpop.f32.mrb[1].mxu0 }
  0xe6   :  { %v108_v16 = vpop.f32.mrb[2].mxu0 }
  0xe7   :  { %v112_v17 = vmax.f32 %v106_v14, 0.0  ;;  %v109_v18 = vadd.f32 %v214_v12, %v108_v16  ;;  %v246_v19 = vpop.f32.mrb[3].mxu0 }
  0xe9   :  { %v113_v20 = vmax.f32 %v109_v18, 0.0  ;;  %255 = vmatprep.mubr.msk.f32.mxu1 %vm125_vm2, %v112_v17 }
  0xeb   :  { %256 = vmatmul.mubr.msk.f32.vlgmr.msra.gmra.mrb[0].mxu1 %vm125_vm2, %v113_v20 }
 0x1be   :  { %v257_v22 = vpop.f32.mrb[0].mxu1 }
 0x1bf   :  { %v204_v23 = vadd.f32 %v257_v22, %v221_v21  ;;  %v198_v24 = vpop.f32.mrb[1].mxu1 }
 0x1c0   :  { %v199_v25 = vadd.f32 %v221_v21, %v198_v24 }
 0x1c1   :  { %209 = vst.msk [vmem:[%s349_s5 + $0x8] sm:$0xff] %vm207_vm3, %v204_v23 }
 0x1c2   :  { %208 = vst.msk [vmem:[%s349_s5] sm:$0xff] %vm207_vm3, %v199_v25 }

</bundles_post_ra>
